<compile_context>
chip_gen: v5e
topology: v5e:2x2
jax: 0.10.0
libtpu: 0.0.40
codegen_flags: <defaults>
</compile_context>

<pallas_src>
import math

import jax
import jax.numpy as jnp
import numpy as np
from jax.experimental import pallas as pl
from jax.experimental.pallas import tpu as pltpu


def temporal_att_kernel(hc_ref, whc_ref, wsel_ref, eexp_ref, ered_ref, b_ref,
                        enc_ref, out_ref, acc_ref, const_ref):
    # hc_ref   : (4, N*B)   rows = [h0, h1, c0, c1], each row is (N, B) flattened
    # whc_ref  : (4, N*B)   fc1 weight rows for h/c, tiled across the N segments
    # wsel_ref : (N*B, N)   wsel[n*B+b, m] = w_enc[b] * (n == m)
    # eexp_ref : (N, N*B)   eexp[n, m*B+b] = (n == m)
    # ered_ref : (N*B, N)   ered[n*B+b, m] = (n == m)
    # b_ref    : (1, 1)     fc1 bias (SMEM)
    # enc_ref  : (tT, N*B)  current T-tile of the encoder output (lane dense)
    # out_ref  : (1, N*B)   attention output (lane dense)
    # acc_ref  : (1, N*B)   f32 running attention accumulator (VMEM scratch)
    # const_ref: (1, N)     f32 t-independent score contribution (VMEM scratch)
    k = pl.program_id(0)

    @pl.when(k == 0)
    def _init():
        acc_ref[...] = jnp.zeros_like(acc_ref)
        # const[n] = sum_{j,b} hc[j,n,b] * w[j,b] + bias  (t-independent, once).
        prod = hc_ref[...].astype(jnp.float32) * whc_ref[...]          # (4, NB)
        col = jnp.sum(prod, axis=0, keepdims=True)                     # (1, NB)
        const_ref[...] = (
            jnp.dot(col, ered_ref[...], preferred_element_type=jnp.float32)
            + b_ref[0, 0])                                             # (1, N)

    enc = enc_ref[...].astype(jnp.float32)                             # (tT, NB)

    # scores[t, n] = sum_b enc[t,n,b] * w_enc[b] + const[n]   (MXU, no XLU reduce)
    scores = jnp.dot(enc, wsel_ref[...],
                     preferred_element_type=jnp.float32) + const_ref[...]   # (tT, N)

    # softmax over the batch dim N (matches F.softmax(z, dim=0) of the reference)
    m = jnp.max(scores, axis=-1, keepdims=True)
    e = jnp.exp(scores - m)
    denom = jnp.sum(e, axis=-1, keepdims=True)
    z = e * pl.reciprocal(denom, approx=True)                          # (tT, N)

    # att[n, b] += sum_t z[t, n] * enc[t, n, b], kept lane dense as (1, N*B):
    # expand z across each B-segment via the MXU, one dense VPU multiply, then a
    # sublane sum over the tile's timesteps into the accumulator.
    zexp = jnp.dot(z, eexp_ref[...], preferred_element_type=jnp.float32)   # (tT, NB)
    acc_ref[...] += jnp.sum(zexp * enc, axis=0, keepdims=True)             # (1, NB)

    @pl.when(k == pl.num_programs(0) - 1)
    def _finalize():
        out_ref[...] = acc_ref[...].astype(out_ref.dtype)


def prepare_temporal_att_params(w_fc1, b_fc1, N):
    """Prepare fc1 weights once per model / batch size (not per decode step)."""
    B = w_fc1.shape[1] // 5
    w5 = w_fc1.reshape(5, B).astype(jnp.float32)     # rows: h0, h1, c0, c1, enc
    eye_n = jnp.eye(N, dtype=jnp.float32)
    return dict(
        whc=jnp.tile(w5[0:4, :], (1, N)),                                # (4, N*B)
        w_sel=jnp.kron(eye_n, w5[4, :].reshape(B, 1)),                   # (N*B, N)
        e_expand=jnp.kron(eye_n, jnp.ones((1, B), jnp.float32)),         # (N, N*B)
        e_reduce=jnp.kron(eye_n, jnp.ones((B, 1), jnp.float32)),         # (N*B, N)
        bias=b_fc1.reshape(1, 1).astype(jnp.float32),                    # (1, 1)
    )


def _choose_t_tile(T, row_bytes, budget_bytes=4 * 1024 * 1024):
    """Largest divisor of T that obeys the (8,128) sublane rule and keeps a
    double-buffered enc block under `budget_bytes` (v7x-safe headroom)."""
    divisors = [d for d in range(1, T + 1) if T % d == 0]
    legal = [d for d in divisors if (d % 8 == 0) or (d == T)]
    fitting = [d for d in legal if 2 * d * row_bytes <= budget_bytes]
    return max(fitting) if fitting else min(legal)


def temporal_att(enc_output, h_p, c_p, params, *, t_tile=None):
    """enc_output: (T, N, B); h_p, c_p: (2, N, B); params from prepare_temporal_att_params."""
    T, N, B = enc_output.shape
    NB = N * B

    # Layout plumbing only (free/contiguous): lane-dense 2-D slabs for the kernel.
    enc2 = enc_output.reshape(T, NB)
    hc2 = jnp.concatenate([h_p, c_p], axis=0).reshape(4, NB)

    if t_tile is None:
        t_tile = _choose_t_tile(T, NB * np.dtype(enc_output.dtype).itemsize)
    assert T % t_tile == 0, "t_tile must divide T"
    assert (t_tile % 8 == 0) or (t_tile == T), "t_tile must satisfy the (8,128) rule"
    grid = (T // t_tile,)

    out2 = pl.pallas_call(
        temporal_att_kernel,
        out_shape=jax.ShapeDtypeStruct((1, NB), enc_output.dtype),
        grid_spec=pltpu.PrefetchScalarGridSpec(
            num_scalar_prefetch=0,
            grid=grid,
            in_specs=[
                pl.BlockSpec((4, NB), lambda k: (0, 0)),    # hc2
                pl.BlockSpec((4, NB), lambda k: (0, 0)),    # whc (tiled fc1 h/c rows)
                pl.BlockSpec((NB, N), lambda k: (0, 0)),    # w_sel
                pl.BlockSpec((N, NB), lambda k: (0, 0)),    # e_expand
                pl.BlockSpec((NB, N), lambda k: (0, 0)),    # e_reduce
                pl.BlockSpec(memory_space=pltpu.MemorySpace.SMEM),   # bias
                pl.BlockSpec((t_tile, NB), lambda k: (k, 0)),        # enc tile
            ],
            out_specs=pl.BlockSpec((1, NB), lambda k: (0, 0)),
            scratch_shapes=[
                pltpu.VMEM((1, NB), jnp.float32),   # att accumulator
                pltpu.VMEM((1, N), jnp.float32),    # t-independent score const
            ],
        ),
        compiler_params=pltpu.CompilerParams(
            # T is a reduction axis (accumulator); softmax couples N, so no
            # parallel axis is available within a single problem.
            dimension_semantics=("arbitrary",),
            vmem_limit_bytes=32 * 1024 * 1024,      # v7x-safe scoped-VMEM budget
        ),
    )(hc2, params["whc"], params["w_sel"], params["e_expand"],
      params["e_reduce"], params["bias"], enc2)

    return out2.reshape(1, N, B)


def temporal_att_ref(enc_output, h_p, c_p, w_fc1, b_fc1):
    """Pure-JAX transcription of the PyTorch forward (loop and all)."""
    T, N, B = enc_output.shape
    hc = jnp.concatenate([h_p, c_p], axis=0)                          # (4, N, B)
    cols = []
    for t in range(T):
        feats = jnp.concatenate([hc, enc_output[t:t + 1]], axis=0)    # (5, N, B)
        feats = jnp.transpose(feats, (1, 0, 2)).reshape(N, 5 * B)     # (N, 5B)
        cols.append(feats @ w_fc1.T + b_fc1)                          # (N, 1)
    z = jnp.concatenate(cols, axis=1)[:, None, :]                     # (N, 1, T)
    z = jax.nn.softmax(z, axis=0)                                     # over batch N
    att = jnp.matmul(z, jnp.transpose(enc_output, (1, 0, 2)))         # (N, 1, B)
    return jnp.transpose(att, (1, 0, 2))                              # (1, N, B)


if __name__ == "__main__":
    configs = [
        # (T, N, B, t_tile): toy shape from the original module ...
        (8, 2, 32, None),
        # ... plus a larger lane-dense shape that exercises the multi-step
        # T-tiled accumulator pipeline and the 128-lane MXU path.
        (32, 8, 128, 8),
    ]
    for (T, N, B, t_tile) in configs:
        key = jax.random.PRNGKey(0)
        k_enc, k_h, k_c, k_w, k_b = jax.random.split(key, 5)
        enc_output = jax.random.normal(k_enc, (T, N, B), dtype=jnp.float32)
        h_p = jax.random.normal(k_h, (2, N, B), dtype=jnp.float32)
        c_p = jax.random.normal(k_c, (2, N, B), dtype=jnp.float32)

        # Deterministic nn.Linear(5B, 1) init: U(-1/sqrt(fan_in), 1/sqrt(fan_in)).
        bound = 1.0 / float(math.sqrt(5 * B))
        w_fc1 = jax.random.uniform(k_w, (1, 5 * B), dtype=jnp.float32,
                                   minval=-bound, maxval=bound)
        b_fc1 = jax.random.uniform(k_b, (1,), dtype=jnp.float32,
                                   minval=-bound, maxval=bound)

        params = prepare_temporal_att_params(w_fc1, b_fc1, N)
        out = temporal_att(enc_output, h_p, c_p, params, t_tile=t_tile)
        out = jax.block_until_ready(out)

        ref = temporal_att_ref(enc_output, h_p, c_p, w_fc1, b_fc1)
        np.testing.assert_allclose(np.asarray(out), np.asarray(ref),
                                   rtol=5e-3, atol=5e-3)
        assert out.shape == (1, N, B)

    print("KERNEL_OK")
</pallas_src>

<mosaic_0001>
module attributes {stable_mosaic.version = 11 : i64} {
  func.func @temporal_att_kernel(%arg0: i32, %arg1: memref<4x64xf32, #tpu.memory_space<vmem>>, %arg2: memref<4x64xf32, #tpu.memory_space<vmem>>, %arg3: memref<64x2xf32, #tpu.memory_space<vmem>>, %arg4: memref<2x64xf32, #tpu.memory_space<vmem>>, %arg5: memref<64x2xf32, #tpu.memory_space<vmem>>, %arg6: memref<1x1xf32, #tpu.memory_space<smem>>, %arg7: memref<8x64xf32, #tpu.memory_space<vmem>>, %arg8: memref<1x64xf32, #tpu.memory_space<vmem>>, %arg9: memref<1x64xf32, #tpu.memory_space<vmem>>, %arg10: memref<1x2xf32, #tpu.memory_space<vmem>>) attributes {dimension_semantics = [#tpu.dimension_semantics<arbitrary>], iteration_bounds = array<i64: 1>, scalar_prefetch = 0 : i64, scratch_operands = 2 : i64, tpu.core_type = #tpu.core_type<tc>, window_params = [{pipeline_mode = #tpu.pipeline_mode<synchronous>, transform_indices = @transform_0, window_bounds = array<i64: 4, 64>}, {pipeline_mode = #tpu.pipeline_mode<synchronous>, transform_indices = @transform_1, window_bounds = array<i64: 4, 64>}, {pipeline_mode = #tpu.pipeline_mode<synchronous>, transform_indices = @transform_2, window_bounds = array<i64: 64, 2>}, {pipeline_mode = #tpu.pipeline_mode<synchronous>, transform_indices = @transform_3, window_bounds = array<i64: 2, 64>}, {pipeline_mode = #tpu.pipeline_mode<synchronous>, transform_indices = @transform_4, window_bounds = array<i64: 64, 2>}, {transform_indices = @transform_5, window_bounds = array<i64: 1, 1>}, {transform_indices = @transform_6, window_bounds = array<i64: 8, 64>}, {pipeline_mode = #tpu.pipeline_mode<synchronous>, transform_indices = @transform_7, window_bounds = array<i64: 1, 64>}]} {
    %c0_i32 = arith.constant 0 : i32
    %0 = arith.cmpi eq, %arg0, %c0_i32 : i32
    %1 = arith.extui %0 : i1 to i32
    %c0_i32_0 = arith.constant 0 : i32
    %2 = arith.cmpi ne, %1, %c0_i32_0 : i32
    scf.if %2 {
      %cst_18 = arith.constant 0.000000e+00 : f32
      %30 = vector.broadcast %cst_18 : f32 to vector<1x64xf32>
      %c0_19 = arith.constant 0 : index
      %c0_20 = arith.constant 0 : index
      %31 = vector.load %arg9[%c0_19, %c0_20] : memref<1x64xf32, #tpu.memory_space<vmem>>, vector<1x64xf32>
      tpu.vector_store %arg9[%c0_19, %c0_20], %30 {strides = array<i32>} : memref<1x64xf32, #tpu.memory_space<vmem>>, vector<1x64xf32>,
      %c0_21 = arith.constant 0 : index
      %c0_22 = arith.constant 0 : index
      %32 = vector.load %arg1[%c0_21, %c0_22] : memref<4x64xf32, #tpu.memory_space<vmem>>, vector<4x64xf32>
      %c0_23 = arith.constant 0 : index
      %c0_24 = arith.constant 0 : index
      %33 = vector.load %arg2[%c0_23, %c0_24] : memref<4x64xf32, #tpu.memory_space<vmem>>, vector<4x64xf32>
      %34 = arith.mulf %32, %33 : vector<4x64xf32>
      %cst_25 = arith.constant dense<0.000000e+00> : vector<64xf32>
      %35 = vector.multi_reduction <add>, %34, %cst_25 [0] : vector<4x64xf32> to vector<64xf32>
      %36 = vector.shape_cast %35 : vector<64xf32> to vector<1x64xf32>
      %c0_26 = arith.constant 0 : index
      %c0_27 = arith.constant 0 : index
      %37 = vector.load %arg5[%c0_26, %c0_27] : memref<64x2xf32, #tpu.memory_space<vmem>>, vector<64x2xf32>
      %cst_28 = arith.constant dense<0.000000e+00> : vector<1x2xf32>
      %38 = tpu.matmul %36, %37, %cst_28 {dimension_numbers = #tpu.dot_dimension_numbers<[1], [0], [0], [1], [0, 0, 1, 1], [], []>} : vector<1x64xf32>, vector<64x2xf32>, vector<1x2xf32> -> vector<1x2xf32>
      %c0_29 = arith.constant 0 : index
      %c0_30 = arith.constant 0 : index
      %39 = memref.load %arg6[%c0_29, %c0_30] : memref<1x1xf32, #tpu.memory_space<smem>>
      %40 = vector.broadcast %39 : f32 to vector<1x2xf32>
      %41 = arith.addf %38, %40 : vector<1x2xf32>
      %c0_31 = arith.constant 0 : index
      %c0_32 = arith.constant 0 : index
      %42 = vector.load %arg10[%c0_31, %c0_32] : memref<1x2xf32, #tpu.memory_space<vmem>>, vector<1x2xf32>
      tpu.vector_store %arg10[%c0_31, %c0_32], %41 {strides = array<i32>} : memref<1x2xf32, #tpu.memory_space<vmem>>, vector<1x2xf32>,
    } else {
    }
    %c0 = arith.constant 0 : index
    %c0_1 = arith.constant 0 : index
    %3 = vector.load %arg7[%c0, %c0_1] : memref<8x64xf32, #tpu.memory_space<vmem>>, vector<8x64xf32>
    %c0_2 = arith.constant 0 : index
    %c0_3 = arith.constant 0 : index
    %4 = vector.load %arg3[%c0_2, %c0_3] : memref<64x2xf32, #tpu.memory_space<vmem>>, vector<64x2xf32>
    %cst = arith.constant dense<0.000000e+00> : vector<8x2xf32>
    %5 = tpu.matmul %3, %4, %cst {dimension_numbers = #tpu.dot_dimension_numbers<[1], [0], [0], [1], [0, 0, 1, 1], [], []>} : vector<8x64xf32>, vector<64x2xf32>, vector<8x2xf32> -> vector<8x2xf32>
    %c0_4 = arith.constant 0 : index
    %c0_5 = arith.constant 0 : index
    %6 = vector.load %arg10[%c0_4, %c0_5] : memref<1x2xf32, #tpu.memory_space<vmem>>, vector<1x2xf32>
    %7 = vector.broadcast %6 : vector<1x2xf32> to vector<8x2xf32>
    %8 = arith.addf %5, %7 : vector<8x2xf32>
    %cst_6 = arith.constant dense<0xFF800000> : vector<8xf32>
    %9 = vector.multi_reduction <maximumf>, %8, %cst_6 [1] : vector<8x2xf32> to vector<8xf32>
    %10 = vector.shape_cast %9 : vector<8xf32> to vector<8x1xf32>
    %11 = vector.broadcast %10 : vector<8x1xf32> to vector<8x2xf32>
    %12 = arith.subf %8, %11 : vector<8x2xf32>
    %13 = math.exp %12 : vector<8x2xf32>
    %cst_7 = arith.constant dense<0.000000e+00> : vector<8xf32>
    %14 = vector.multi_reduction <add>, %13, %cst_7 [1] : vector<8x2xf32> to vector<8xf32>
    %15 = vector.shape_cast %14 : vector<8xf32> to vector<8x1xf32>
    %16 = tpu.reciprocal %15 {approx = true} : vector<8x1xf32> -> vector<8x1xf32>
    %17 = vector.broadcast %16 : vector<8x1xf32> to vector<8x2xf32>
    %18 = arith.mulf %13, %17 : vector<8x2xf32>
    %c0_8 = arith.constant 0 : index
    %c0_9 = arith.constant 0 : index
    %19 = vector.load %arg4[%c0_8, %c0_9] : memref<2x64xf32, #tpu.memory_space<vmem>>, vector<2x64xf32>
    %cst_10 = arith.constant dense<0.000000e+00> : vector<8x64xf32>
    %20 = tpu.matmul %18, %19, %cst_10 {dimension_numbers = #tpu.dot_dimension_numbers<[1], [0], [0], [1], [0, 0, 1, 1], [], []>} : vector<8x2xf32>, vector<2x64xf32>, vector<8x64xf32> -> vector<8x64xf32>
    %c0_11 = arith.constant 0 : index
    %c0_12 = arith.constant 0 : index
    %21 = vector.load %arg9[%c0_11, %c0_12] : memref<1x64xf32, #tpu.memory_space<vmem>>, vector<1x64xf32>
    %22 = arith.mulf %20, %3 : vector<8x64xf32>
    %cst_13 = arith.constant dense<0.000000e+00> : vector<64xf32>
    %23 = vector.multi_reduction <add>, %22, %cst_13 [0] : vector<8x64xf32> to vector<64xf32>
    %24 = vector.shape_cast %23 : vector<64xf32> to vector<1x64xf32>
    %25 = arith.addf %21, %24 : vector<1x64xf32>
    %c0_14 = arith.constant 0 : index
    %c0_15 = arith.constant 0 : index
    %26 = vector.load %arg9[%c0_14, %c0_15] : memref<1x64xf32, #tpu.memory_space<vmem>>, vector<1x64xf32>
    tpu.vector_store %arg9[%c0_14, %c0_15], %25 {strides = array<i32>} : memref<1x64xf32, #tpu.memory_space<vmem>>, vector<1x64xf32>,
    %c0_i32_16 = arith.constant 0 : i32
    %27 = arith.cmpi eq, %arg0, %c0_i32_16 : i32
    %28 = arith.extui %27 : i1 to i32
    %c0_i32_17 = arith.constant 0 : i32
    %29 = arith.cmpi ne, %28, %c0_i32_17 : i32
    scf.if %29 {
      %c0_18 = arith.constant 0 : index
      %c0_19 = arith.constant 0 : index
      %30 = vector.load %arg9[%c0_18, %c0_19] : memref<1x64xf32, #tpu.memory_space<vmem>>, vector<1x64xf32>
      %c0_20 = arith.constant 0 : index
      %c0_21 = arith.constant 0 : index
      %31 = vector.load %arg8[%c0_20, %c0_21] : memref<1x64xf32, #tpu.memory_space<vmem>>, vector<1x64xf32>
      tpu.vector_store %arg8[%c0_20, %c0_21], %30 {strides = array<i32>} : memref<1x64xf32, #tpu.memory_space<vmem>>, vector<1x64xf32>,
    } else {
    }
    return
  }
  func.func @transform_0(%arg0: i32) -> (i32, i32) {
    %c0_i32 = arith.constant 0 : i32
    %c0_i32_0 = arith.constant 0 : i32
    %c0_i32_1 = arith.constant 0 : i32
    return %c0_i32, %c0_i32_0 : i32, i32
  }
  func.func @transform_1(%arg0: i32) -> (i32, i32) {
    %c0_i32 = arith.constant 0 : i32
    %c0_i32_0 = arith.constant 0 : i32
    %c0_i32_1 = arith.constant 0 : i32
    return %c0_i32, %c0_i32_0 : i32, i32
  }
  func.func @transform_2(%arg0: i32) -> (i32, i32) {
    %c0_i32 = arith.constant 0 : i32
    %c0_i32_0 = arith.constant 0 : i32
    %c0_i32_1 = arith.constant 0 : i32
    return %c0_i32, %c0_i32_0 : i32, i32
  }
  func.func @transform_3(%arg0: i32) -> (i32, i32) {
    %c0_i32 = arith.constant 0 : i32
    %c0_i32_0 = arith.constant 0 : i32
    %c0_i32_1 = arith.constant 0 : i32
    return %c0_i32, %c0_i32_0 : i32, i32
  }
  func.func @transform_4(%arg0: i32) -> (i32, i32) {
    %c0_i32 = arith.constant 0 : i32
    %c0_i32_0 = arith.constant 0 : i32
    %c0_i32_1 = arith.constant 0 : i32
    return %c0_i32, %c0_i32_0 : i32, i32
  }
  func.func @transform_5(%arg0: i32) -> (i32, i32) {
    %c0_i32 = arith.constant 0 : i32
    %c0_i32_0 = arith.constant 0 : i32
    %c0_i32_1 = arith.constant 0 : i32
    return %c0_i32, %c0_i32_0 : i32, i32
  }
  func.func @transform_6(%arg0: i32) -> (i32, i32) {
    %c0_i32 = arith.constant 0 : i32
    %c0_i32_0 = arith.constant 0 : i32
    return %arg0, %c0_i32 : i32, i32
  }
  func.func @transform_7(%arg0: i32) -> (i32, i32) {
    %c0_i32 = arith.constant 0 : i32
    %c0_i32_0 = arith.constant 0 : i32
    %c0_i32_1 = arith.constant 0 : i32
    return %c0_i32, %c0_i32_0 : i32, i32
  }
}

</mosaic_0001>

<bundles_post_ra>
// kernel: tpu_custom_call.1
= control target key start
LH: loop header
LB: loop body
LE: loop exit
PB: predicated region body
PF: predicated region fallthrough
CT: control target
= control target key end

     0   :  { %vm37_vm0 = vcmask 519168   ;;  %s345_s0 = inlined_call_operand.vmem [shape: f32[4,64], index: 0, kind: input, shape index: {}]   ;;  %s346_s1 = inlined_call_operand.vmem [shape: f32[4,64], index: 1, kind: input, shape index: {}]   ;;  %s347_s2 = inlined_call_operand.vmem [shape: f32[64,2], index: 2, kind: input, shape index: {}]   ;;  %s348_s3 = inlined_call_operand.vmem [shape: f32[2,64], index: 3, kind: input, shape index: {}]   ;;  %s349_s4 = inlined_call_operand.vmem [shape: f32[64,2], index: 4, kind: input, shape index: {}]   ;;  %s350_s5 = inlined_call_operand.<no memory space> [shape: f32[1,1], index: 5, kind: input, shape index: {}]   ;;  %s351_s6 = inlined_call_operand.vmem [shape: f32[8,64], index: 6, kind: input, shape index: {}]   ;;  %s352_s7 = inlined_call_operand.hbm [shape: f32[1,64], index: 7, kind: output, shape index: {}]  }
   0x1   :  { %v52_v0 = vld [vmem:[%s349_s4 + $0x38] sm:$0xff]  ;;  %v51_v1 = vld [vmem:[%s349_s4 + $0x30] sm:$0xff]  ;;  %v50_v2 = vld [vmem:[%s349_s4 + $0x28] sm:$0xff] }
   0x2   :  { %67 = vmatpush.msra.mxu0 %v52_v0  ;;  %v89_v3 = vld [vmem:[%s347_s2 + $0x38] sm:$0xff]  ;;  %v88_v4 = vld [vmem:[%s347_s2 + $0x30] sm:$0xff]  ;;  %v34_v5 = vld [vmem:[%s345_s0] sm:$0xf] }
   0x3   :  { %106 = vmatpush.msra.mxu1 %v89_v3  ;;  %v35_v6 = vld [vmem:[%s346_s1] sm:$0xf]  ;;  %v87_v9 = vld [vmem:[%s347_s2 + $0x28] sm:$0xff]  ;;  %v48_v10 = vld [vmem:[%s349_s4 + $0x18] sm:$0xff] }
   0x4   :  { %68 = vmatpush.msra.mxu0 %v51_v1  ;;  %v49_v7 = vld [vmem:[%s349_s4 + $0x20] sm:$0xff]  ;;  %v36_v8 = vmul.f32 %v35_v6, %v34_v5 }
   0x5   :  { %107 = vmatpush.msra.mxu1 %v88_v4  ;;  %v86_v12 = vld [vmem:[%s347_s2 + $0x20] sm:$0xff] }
   0x6   :  { %69 = vmatpush.msra.mxu0 %v50_v2  ;;  %v38_v11 = vsel %vm37_vm0, %v36_v8, 0.0 }
   0x7   :  { %13 = vsyncpa [#allocation6], 0  ;;  %v39_v13 = vrot.slane %v38_v11, 4  ;;  %108 = vmatpush.msra.mxu1 %v87_v9  ;;  %v47_v14 = vld [vmem:[%s349_s4 + $0x10] sm:$0xff]  ;;  %v85_v15 = vld [vmem:[%s347_s2 + $0x18] sm:$0xff]  ;;  %vm55_vm1 = vcmask 523264   ;;  %v54_v27 = vstv %s350_s5 }
   0x8   :  { %70 = vmatpush.msra.mxu0 %v49_v7  ;;  %v46_v17 = vld [vmem:[%s349_s4 + $0x8] sm:$0xff]  ;;  %v84_v18 = vld [vmem:[%s347_s2 + $0x10] sm:$0xff]  ;;  %v45_v20 = vld [vmem:[%s349_s4] sm:$0xff]  ;;  %vm79_vm2 = vcmask 8192   ;;  %vm118_vm3 = vcmask 15360   ;;  %vm134_vm4 = vcmask 1041408  }
   0x9   :  { %v40_v16 = vadd.f32 %v39_v13, %v38_v11  ;;  %109 = vmatpush.msra.mxu1 %v86_v12  ;;  %v83_v21 = vld [vmem:[%s347_s2 + $0x8] sm:$0xff]  ;;  %v82_v23 = vld [vmem:[%s347_s2] sm:$0xff]  ;;  %vm32_vm5 = vcmask 516096   ;;  %v228_v43 = vmov 0.0   ;;  %s182_s17 = sshll.u32 %s352_s7, 4  ;;  %s183_s17 = int_to_ptr.hbm [resolvable:$true] %s182_s17 }
   0xa   :  { %71 = vmatpush.msra.mxu0 %v48_v10  ;;  %v81_v25 = vld [vmem:[%s351_s6] sm:$0xff]  ;;  %33 = vst.msk [vmem:[#allocation2] sm:$0x1] %vm32_vm5, %v228_v43 }
   0xb   :  { %v41_v19 = vrot.slane %v40_v16, 2  ;;  %110 = vmatpush.msra.mxu1 %v85_v15  ;;  %v130_v39 = vld [vmem:[%s348_s3] sm:$0x3]  ;;  %s229_s3 = smov [#allocation5]  }
   0xc   :  { %72 = vmatpush.msra.mxu0 %v47_v14  ;;  %193 = vmatpush.msk.msra.mxu2 %vm134_vm4, %v130_v39  ;;  %s180_s6 = sshll.u32 %s229_s3, 4  ;;  %s181_s6 = int_to_ptr.vmem [resolvable:$true] %s180_s6 }
   0xd   :  { %v42_v22 = vadd.f32 %v41_v19, %v40_v16  ;;  %111 = vmatpush.msra.mxu1 %v84_v18 }
   0xe   :  { %73 = vmatpush.msra.mxu0 %v46_v17 }
   0xf   :  { %v43_v24 = vrot.slane %v42_v22, 1  ;;  %112 = vmatpush.msra.mxu1 %v83_v21 }
  0x10   :  { %74 = vmatpush.msra.mxu0 %v45_v20 }
  0x11   :  { %v44_v26 = vadd.f32 %v43_v24, %v42_v22  ;;  %113 = vmatpush.msra.mxu1 %v82_v23  ;;  %v158_v52 = vld [vmem:[#allocation2] sm:$0x1] }
  0x12   :  { %192 = vmatmul.msk.f32.vlgmr.msra.gmra.mxu1 %vm55_vm1, %v81_v25 }
  0x13   :  { %191 = vmatmul.msk.f32.vlgmr.msra.gmra.mxu0 %vm55_vm1, %v44_v26 }
  0x8f   :  { %v115_v30 = vpop.f32.mrf.mxu1 }
  0x90   :  { %v76_v28 = vpop.f32.mrf.mxu0 }
  0x91   :  { %v77_v29 = vadd.f32 %v76_v28, %v54_v27 }
  0x93   :  { %80 = vst.msk [vmem:[#allocation3] sm:$0x1] %vm79_vm2, %v77_v29 }
  0x9a   :  { %v197_v31 = vld [vmem:[#allocation3] ss:$0 sm:$0xff] }
  0x9b   :  { %v116_v32 = vadd.f32 %v197_v31, %v115_v30 }
  0x9d   :  { %v119_v33 = vsel %vm118_vm3, %v116_v32, -inf }
  0x9e   :  { %120 = vmax.xlane.f32.xlu0 %v119_v33 }
 0x111   :  { %v121_v34 = vpop.xlane.xlu0 %120 }
 0x112   :  { %v122_v35 = vsub.f32 %v116_v32, %v121_v34 }
 0x114   :  { %v123_v36 = vmul.f32 1.442695, %v122_v35 }
 0x116   :  { %198 = vpow2.f32 %v123_v36 }
 0x11c   :  { %v199_v37 = vpop.eup %198 }
 0x11d   :  { %v125_v38 = vsel %vm118_vm3, %v199_v37, 0.0 }
 0x11e   :  { %126 = vadd.xlane.f32.xlu0 %v125_v38 }
 0x191   :  { %v127_v40 = vpop.xlane.xlu0 %126 }
 0x192   :  { %200 = vrcp.f32 %v127_v40 }
 0x198   :  { %v201_v41 = vpop.eup %200 }
 0x199   :  { %v129_v42 = vmul.f32 %v201_v41, %v199_v37 }
 0x19b   :  { %194 = vmatmul.msk.f32.vlgmr.msra.gmra.mxu2 %vm118_vm3, %v129_v42 }
 0x21e   :  { %v155_v44 = vpop.f32.mrf.mxu2 }
 0x21f   :  { %v159_v45 = vmul.f32 %v155_v44, %v81_v25 }
 0x221   :  { %v160_v46 = vsel %vm55_vm1, %v159_v45, 0.0 }
 0x222   :  { %v161_v47 = vrot.slane %v160_v46, 4 }
 0x224   :  { %v162_v48 = vadd.f32 %v161_v47, %v160_v46 }
 0x226   :  { %v163_v49 = vrot.slane %v162_v48, 2 }
 0x228   :  { %v164_v50 = vadd.f32 %v163_v49, %v162_v48 }
 0x22a   :  { %v165_v51 = vrot.slane %v164_v50, 1 }
 0x22c   :  { %v166_v53 = vadd.f32 %v165_v51, %v164_v50 }
 0x22e   :  { %v167_v54 = vadd.f32 %v166_v53, %v158_v52 }
 0x230   :  { %169 = vst.msk [vmem:[#allocation2] sm:$0x1] %vm32_vm5, %v167_v54 }
 0x237   :  { %v173_v55 = vld [vmem:[#allocation2] sm:$0x1] }
 0x238   :  { %174 = vst.msk [vmem:[#allocation5] sm:$0x1] %vm32_vm5, %v173_v55 }
 0x239   :  { %185 = dma.vmem_to_hbm [thread:$0]  %s181_s6, 16, %s183_s17, [#allocation6]  }
 0x23a   :  { %226 = dma.done.wait [#allocation6], 16  }
 0x23b   :  { %227 = vsyncadd [#allocation6], 4294967280 }
 0x23c   :  { %190 = vsyncpa [#allocation6], 1 }

</bundles_post_ra>
